<compile_context>
chip_gen: v5e
topology: v5e:2x2
jax: 0.10.0
libtpu: 0.0.40
codegen_flags: <defaults>
</compile_context>

<pallas_src>
import functools

import jax
import jax.numpy as jnp
import numpy as np
from jax import lax
from jax.experimental import pallas as pl
from jax.experimental.pallas import tpu as pltpu

MASK_VAL = -1e30                       # finite "minus infinity" (no (-inf)-(-inf) NaNs)
VMEM_LIMIT = 48 * 1024 * 1024          # fits v7x (64 MiB physical), >> v5e scoped default


# --------------------------------------------------------------------------------------
# Generic tiled matmul + bias kernel (used for the QKV projection and the W_O projection)
# --------------------------------------------------------------------------------------
def _linear_kernel(x_ref, w_ref, b_ref, o_ref, acc_ref):
    @pl.when(pl.program_id(2) == 0)
    def _init():
        acc_ref[...] = jnp.zeros_like(acc_ref)

    acc_ref[...] += jnp.dot(x_ref[...], w_ref[...], preferred_element_type=jnp.float32)

    @pl.when(pl.program_id(2) == pl.num_programs(2) - 1)
    def _finalize():
        o_ref[...] = (acc_ref[...] + b_ref[...]).astype(o_ref.dtype)


def linear(x, w, b, *, out_dtype, tm=128, tn=256, tk=256):
    """out = x @ w + b, tiled for the MXU with f32 accumulation."""
    M, K = x.shape
    Kw, N = w.shape
    assert K == Kw
    tm = M if M <= tm else tm
    tn = N if N <= tn else tn
    tk = K if K <= tk else tk
    assert M % tm == 0 and N % tn == 0 and K % tk == 0

    return pl.pallas_call(
        _linear_kernel,
        out_shape=jax.ShapeDtypeStruct((M, N), out_dtype),
        grid=(M // tm, N // tn, K // tk),
        in_specs=[
            pl.BlockSpec((tm, tk), lambda i, j, k: (i, k)),
            pl.BlockSpec((tk, tn), lambda i, j, k: (k, j)),
            pl.BlockSpec((1, tn), lambda i, j, k: (0, j)),
        ],
        out_specs=pl.BlockSpec((tm, tn), lambda i, j, k: (i, j)),
        scratch_shapes=[pltpu.VMEM((tm, tn), jnp.float32)],
        compiler_params=pltpu.CompilerParams(
            dimension_semantics=("parallel", "parallel", "arbitrary"),
            vmem_limit_bytes=VMEM_LIMIT,
        ),
    )(x, w, b.reshape(1, N))


# --------------------------------------------------------------------------------------
# Flash attention kernel: grid (batch, heads, q_tiles, kv_tiles); kv is the reduction axis
# --------------------------------------------------------------------------------------
def _flash_kernel(q_ref, k_ref, v_ref, mask_ref, o_ref,
                  m_sc, l_sc, acc_sc, *, q_tile, kv_tile):
    qi = pl.program_id(2)
    kv = pl.program_id(3)

    @pl.when(kv == 0)
    def _init():
        m_sc[...] = jnp.full_like(m_sc, MASK_VAL)
        l_sc[...] = jnp.zeros_like(l_sc)
        acc_sc[...] = jnp.zeros_like(acc_sc)

    # Skip kv blocks entirely above the causal diagonal.
    block_needed = kv * kv_tile <= qi * q_tile + (q_tile - 1)

    @pl.when(block_needed)
    def _process():
        q = q_ref[0, 0]                   # (q_tile, d_head); softmax scale pre-folded
        k = k_ref[0, 0]                   # (kv_tile, d_head)
        v = v_ref[0, 0]                   # (kv_tile, d_head)
        key_pad = mask_ref[0]             # (1, kv_tile); 0.0 => masked key

        # scores: contract the LAST dims of q and k (MXU takes the transposed operand
        # natively; no XLU transpose / kh.T materialization)
        s = lax.dot_general(q, k, (((1,), (1,)), ((), ())),
                            preferred_element_type=jnp.float32)   # (q_tile, kv_tile)

        q_pos = qi * q_tile + lax.broadcasted_iota(jnp.int32, (q_tile, kv_tile), 0)
        k_pos = kv * kv_tile + lax.broadcasted_iota(jnp.int32, (q_tile, kv_tile), 1)
        bad = (k_pos > q_pos) | (key_pad == 0.0)      # fused causal + padding mask
        s = jnp.where(bad, MASK_VAL, s)               # single select per block

        m_prev = m_sc[...]
        m_new = jnp.maximum(m_prev, jnp.max(s, axis=-1, keepdims=True))
        alpha = jnp.exp(m_prev - m_new)
        p = jnp.exp(s - m_new)                        # masked entries -> exactly 0
        l_sc[...] = alpha * l_sc[...] + jnp.sum(p, axis=-1, keepdims=True)
        acc_sc[...] = alpha * acc_sc[...] + jnp.dot(
            p.astype(v.dtype), v, preferred_element_type=jnp.float32)
        m_sc[...] = m_new

    @pl.when(kv == pl.num_programs(3) - 1)
    def _finalize():
        # Exact division (runs once per (batch, head, q_tile); keeps full f32 precision).
        # Note: rows whose every visible key is masked produce Inf/NaN here, matching the
        # pure softmax reference (softmax over all -inf).
        o_ref[0, 0] = (acc_sc[...] / l_sc[...]).astype(o_ref.dtype)


def attention_forward(x, attention_mask, w_attn, b_attn, w_o, b_o, *, n_heads,
                      compute_dtype=jnp.bfloat16, q_tile=None, kv_tile=None):
    batch, seq, d_model = x.shape
    d_head = d_model // n_heads
    assert n_heads * d_head == d_model
    if attention_mask is None:
        attention_mask = jnp.ones((batch, seq), dtype=jnp.float32)

    # 128 tiles are MXU-native on all generations; raise to 256 on v6e/v7x for the 2x256 MXU.
    q_tile = q_tile or min(seq, 128)
    kv_tile = kv_tile or min(seq, 128)
    assert seq % q_tile == 0 and seq % kv_tile == 0
    n_q, n_kv = seq // q_tile, seq // kv_tile

    # ---- 1) QKV projection: one lane-dense matmul, done ONCE (hoisted out of the kv loop) ----
    x2 = x.reshape(batch * seq, d_model).astype(compute_dtype)
    qkv = linear(x2, w_attn.astype(compute_dtype), b_attn.astype(jnp.float32),
                 out_dtype=jnp.float32)                      # (batch*seq, 3*d_model)

    # Head-major layout (pure XLA layout plumbing); softmax scale folded into Q once.
    qkv = qkv.reshape(batch, seq, 3, n_heads, d_head)
    scale = 1.0 / (d_head ** 0.5)
    q = (qkv[:, :, 0] * scale).transpose(0, 2, 1, 3).astype(compute_dtype)  # (b, h, s, dh)
    k = qkv[:, :, 1].transpose(0, 2, 1, 3).astype(compute_dtype)
    v = qkv[:, :, 2].transpose(0, 2, 1, 3).astype(compute_dtype)
    mask3 = attention_mask.reshape(batch, 1, seq).astype(jnp.float32)

    # ---- 2) flash attention over precomputed per-head Q/K/V tiles ----
    flash = functools.partial(_flash_kernel, q_tile=q_tile, kv_tile=kv_tile)
    attn = pl.pallas_call(
        flash,
        out_shape=jax.ShapeDtypeStruct((batch, n_heads, seq, d_head), compute_dtype),
        grid=(batch, n_heads, n_q, n_kv),
        in_specs=[
            pl.BlockSpec((1, 1, q_tile, d_head), lambda b, h, qi, kv: (b, h, qi, 0)),   # Q
            pl.BlockSpec((1, 1, kv_tile, d_head), lambda b, h, qi, kv: (b, h, kv, 0)),  # K
            pl.BlockSpec((1, 1, kv_tile, d_head), lambda b, h, qi, kv: (b, h, kv, 0)),  # V
            pl.BlockSpec((1, 1, kv_tile), lambda b, h, qi, kv: (b, 0, kv)),             # pad mask
        ],
        out_specs=pl.BlockSpec((1, 1, q_tile, d_head), lambda b, h, qi, kv: (b, h, qi, 0)),
        scratch_shapes=[
            pltpu.VMEM((q_tile, 1), jnp.float32),        # running max m
            pltpu.VMEM((q_tile, 1), jnp.float32),        # running denom l
            pltpu.VMEM((q_tile, d_head), jnp.float32),   # weighted-V accumulator
        ],
        compiler_params=pltpu.CompilerParams(
            dimension_semantics=("parallel", "parallel", "parallel", "arbitrary"),
            vmem_limit_bytes=VMEM_LIMIT,
        ),
    )(q, k, v, mask3)

    # ---- 3) output projection: inter @ W_O + b_O (lane-dense N = d_model) ----
    inter = attn.transpose(0, 2, 1, 3).reshape(batch * seq, d_model).astype(compute_dtype)
    out = linear(inter, w_o.astype(compute_dtype), b_o.astype(jnp.float32),
                 out_dtype=jnp.float32)
    return out.reshape(batch, seq, d_model)


# --------------------------------------------------------------------------------------
# Pure-JAX reference mirroring the PyTorch module semantics
# --------------------------------------------------------------------------------------
def ref_attention(x, attention_mask, w_attn, b_attn, w_o, b_o, *, n_heads):
    batch, seq, d_model = x.shape
    d_head = d_model // n_heads
    qkv = x @ w_attn + b_attn
    q, k, v = jnp.split(qkv, 3, axis=-1)
    q = q.reshape(batch, seq, n_heads, d_head).transpose(0, 2, 1, 3)
    k = k.reshape(batch, seq, n_heads, d_head).transpose(0, 2, 1, 3)
    v = v.reshape(batch, seq, n_heads, d_head).transpose(0, 2, 1, 3)
    scores = jnp.einsum('bhqd,bhkd->bhqk', q, k) / (d_head ** 0.5)
    am = attention_mask[:, None, None, :]
    scores = jnp.where(am == 0.0, -jnp.inf, scores)
    causal = jnp.triu(jnp.ones((seq, seq), bool), k=1)
    scores = jnp.where(causal, -jnp.inf, scores)
    probs = jax.nn.softmax(scores, axis=-1)
    inter = jnp.einsum('bhqk,bhkd->bhqd', probs, v)
    inter = inter.transpose(0, 2, 1, 3).reshape(batch, seq, d_model)
    return inter @ w_o + b_o


if __name__ == "__main__":
    # TransformerConfig-equivalent small sizes
    batch, seq, d_model, n_heads = 2, 8, 32, 4
    init_range = 0.02

    key = jax.random.PRNGKey(0)
    kx, kwa, kba, kwo, kbo = jax.random.split(key, 5)

    x = jax.random.normal(kx, (batch, seq, d_model), dtype=jnp.float32)
    w_attn = init_range * jax.random.normal(kwa, (d_model, 3 * d_model), dtype=jnp.float32)
    b_attn = init_range * jax.random.normal(kba, (3 * d_model,), dtype=jnp.float32)
    w_o = init_range * jax.random.normal(kwo, (d_model, d_model), dtype=jnp.float32)
    b_o = init_range * jax.random.normal(kbo, (d_model,), dtype=jnp.float32)

    # attention_mask: 1 = attend, 0 = masked key; mask out last key of batch 1
    attention_mask = jnp.ones((batch, seq), dtype=jnp.float32).at[1, seq - 1].set(0.0)

    ref = ref_attention(x, attention_mask, w_attn, b_attn, w_o, b_o, n_heads=n_heads)

    # f32-operand path: structural correctness check
    out_f32 = attention_forward(x, attention_mask, w_attn, b_attn, w_o, b_o,
                                n_heads=n_heads, compute_dtype=jnp.float32)
    out_f32 = jax.block_until_ready(out_f32)
    np.testing.assert_allclose(np.asarray(out_f32), np.asarray(ref), rtol=1e-3, atol=1e-3)

    # bf16-operand / f32-accumulate path (the MXU-fast configuration for v6e/v7x)
    out_bf16 = attention_forward(x, attention_mask, w_attn, b_attn, w_o, b_o,
                                 n_heads=n_heads, compute_dtype=jnp.bfloat16)
    out_bf16 = jax.block_until_ready(out_bf16)
    np.testing.assert_allclose(np.asarray(out_bf16), np.asarray(ref), rtol=1e-1, atol=2e-2)

    print("KERNEL_OK")
</pallas_src>

<mosaic_0001>
module attributes {stable_mosaic.version = 11 : i64} {
  func.func @_linear_kernel(%arg0: i32, %arg1: i32, %arg2: i32, %arg3: memref<16x32xf32, #tpu.memory_space<vmem>>, %arg4: memref<32x96xf32, #tpu.memory_space<vmem>>, %arg5: memref<1x96xf32, #tpu.memory_space<vmem>>, %arg6: memref<16x96xf32, #tpu.memory_space<vmem>>, %arg7: memref<16x96xf32, #tpu.memory_space<vmem>>) attributes {dimension_semantics = [#tpu.dimension_semantics<parallel>, #tpu.dimension_semantics<parallel>, #tpu.dimension_semantics<arbitrary>], iteration_bounds = array<i64: 1, 1, 1>, scalar_prefetch = 0 : i64, scratch_operands = 1 : i64, tpu.core_type = #tpu.core_type<tc>, window_params = [{transform_indices = @transform_0, window_bounds = array<i64: 16, 32>}, {transform_indices = @transform_1, window_bounds = array<i64: 32, 96>}, {transform_indices = @transform_2, window_bounds = array<i64: 1, 96>}, {transform_indices = @transform_3, window_bounds = array<i64: 16, 96>}]} {
    %c0_i32 = arith.constant 0 : i32
    %0 = arith.cmpi eq, %arg2, %c0_i32 : i32
    %1 = arith.extui %0 : i1 to i32
    %c0_i32_0 = arith.constant 0 : i32
    %2 = arith.cmpi ne, %1, %c0_i32_0 : i32
    scf.if %2 {
      %cst_10 = arith.constant 0.000000e+00 : f32
      %12 = vector.broadcast %cst_10 : f32 to vector<16x96xf32>
      %c0_11 = arith.constant 0 : index
      %c0_12 = arith.constant 0 : index
      %13 = vector.load %arg7[%c0_11, %c0_12] : memref<16x96xf32, #tpu.memory_space<vmem>>, vector<16x96xf32>
      tpu.vector_store %arg7[%c0_11, %c0_12], %12 {strides = array<i32>} : memref<16x96xf32, #tpu.memory_space<vmem>>, vector<16x96xf32>,
    } else {
    }
    %c0 = arith.constant 0 : index
    %c0_1 = arith.constant 0 : index
    %3 = vector.load %arg7[%c0, %c0_1] : memref<16x96xf32, #tpu.memory_space<vmem>>, vector<16x96xf32>
    %c0_2 = arith.constant 0 : index
    %c0_3 = arith.constant 0 : index
    %4 = vector.load %arg3[%c0_2, %c0_3] : memref<16x32xf32, #tpu.memory_space<vmem>>, vector<16x32xf32>
    %c0_4 = arith.constant 0 : index
    %c0_5 = arith.constant 0 : index
    %5 = vector.load %arg4[%c0_4, %c0_5] : memref<32x96xf32, #tpu.memory_space<vmem>>, vector<32x96xf32>
    %cst = arith.constant dense<0.000000e+00> : vector<16x96xf32>
    %6 = tpu.matmul %4, %5, %cst {dimension_numbers = #tpu.dot_dimension_numbers<[1], [0], [0], [1], [0, 0, 1, 1], [], []>} : vector<16x32xf32>, vector<32x96xf32>, vector<16x96xf32> -> vector<16x96xf32>
    %7 = arith.addf %3, %6 : vector<16x96xf32>
    %c0_6 = arith.constant 0 : index
    %c0_7 = arith.constant 0 : index
    %8 = vector.load %arg7[%c0_6, %c0_7] : memref<16x96xf32, #tpu.memory_space<vmem>>, vector<16x96xf32>
    tpu.vector_store %arg7[%c0_6, %c0_7], %7 {strides = array<i32>} : memref<16x96xf32, #tpu.memory_space<vmem>>, vector<16x96xf32>,
    %c0_i32_8 = arith.constant 0 : i32
    %9 = arith.cmpi eq, %arg2, %c0_i32_8 : i32
    %10 = arith.extui %9 : i1 to i32
    %c0_i32_9 = arith.constant 0 : i32
    %11 = arith.cmpi ne, %10, %c0_i32_9 : i32
    scf.if %11 {
      %c0_10 = arith.constant 0 : index
      %c0_11 = arith.constant 0 : index
      %12 = vector.load %arg7[%c0_10, %c0_11] : memref<16x96xf32, #tpu.memory_space<vmem>>, vector<16x96xf32>
      %c0_12 = arith.constant 0 : index
      %c0_13 = arith.constant 0 : index
      %13 = vector.load %arg5[%c0_12, %c0_13] : memref<1x96xf32, #tpu.memory_space<vmem>>, vector<1x96xf32>
      %14 = vector.broadcast %13 : vector<1x96xf32> to vector<16x96xf32>
      %15 = arith.addf %12, %14 : vector<16x96xf32>
      %c0_14 = arith.constant 0 : index
      %c0_15 = arith.constant 0 : index
      %16 = vector.load %arg6[%c0_14, %c0_15] : memref<16x96xf32, #tpu.memory_space<vmem>>, vector<16x96xf32>
      tpu.vector_store %arg6[%c0_14, %c0_15], %15 {strides = array<i32>} : memref<16x96xf32, #tpu.memory_space<vmem>>, vector<16x96xf32>,
    } else {
    }
    return
  }
  func.func @transform_0(%arg0: i32, %arg1: i32, %arg2: i32) -> (i32, i32) {
    %c0_i32 = arith.constant 0 : i32
    return %arg0, %arg2 : i32, i32
  }
  func.func @transform_1(%arg0: i32, %arg1: i32, %arg2: i32) -> (i32, i32) {
    %c0_i32 = arith.constant 0 : i32
    return %arg2, %arg1 : i32, i32
  }
  func.func @transform_2(%arg0: i32, %arg1: i32, %arg2: i32) -> (i32, i32) {
    %c0_i32 = arith.constant 0 : i32
    %c0_i32_0 = arith.constant 0 : i32
    return %c0_i32, %arg1 : i32, i32
  }
  func.func @transform_3(%arg0: i32, %arg1: i32, %arg2: i32) -> (i32, i32) {
    %c0_i32 = arith.constant 0 : i32
    return %arg0, %arg1 : i32, i32
  }
}

</mosaic_0001>

<bundles_post_ra>
// kernel: tpu_custom_call.1
= control target key start
LH: loop header
LB: loop body
LE: loop exit
PB: predicated region body
PF: predicated region fallthrough
CT: control target
= control target key end

     0   :  { %8 = vsyncpa [#allocation4], 0  ;;  %s274_s0 = inlined_call_operand.hbm [shape: f32[16,32], index: 0, kind: input, shape index: {}]   ;;  %s275_s1 = inlined_call_operand.hbm [shape: f32[32,96], index: 1, kind: input, shape index: {}]   ;;  %s276_s2 = inlined_call_operand.vmem [shape: f32[1,96], index: 2, kind: input, shape index: {}]   ;;  %s277_s3 = inlined_call_operand.hbm [shape: f32[16,96], index: 3, kind: output, shape index: {}]  }
   0x1   :  { %9 = vsyncpa [#allocation7], 0 }
   0x2   :  { %10 = vsyncpa [#allocation5], 0  ;;  %s15_s14 = sshll.u32 %s274_s0, 4  ;;  %s221_s15 = smov [#allocation3]   ;;  %s16_s14 = int_to_ptr.hbm [resolvable:$true] %s15_s14 }
   0x3   :  { %s17_s16 = sshll.u32 %s221_s15, 4  ;;  %s28_s19 = sshll.u32 %s275_s1, 4  ;;  %s18_s16 = int_to_ptr.vmem [resolvable:$true] %s17_s16  ;;  %s29_s19 = int_to_ptr.hbm [resolvable:$true] %s28_s19 }
   0x4   :  { %s222_s20 = smov 128   ;;  %s223_s21 = smov 8  }
   0x5   :  { %23 = dma.hbm_to_vmem [thread:$0]  %s16_s14, 256, %s18_s16, [#allocation4], %s222_s20, %s222_s20, %s223_s21  }
   0x6   :  { %s224_s22 = smov [#allocation6]  }
   0x7   :  { %s30_s23 = sshll.u32 %s224_s22, 4  ;;  %s31_s23 = int_to_ptr.vmem [resolvable:$true] %s30_s23 }
   0x8   :  { %36 = dma.hbm_to_vmem [thread:$0]  %s29_s19, 512, %s31_s23, [#allocation7], %s222_s20, %s222_s20, %s223_s21  }
   0x9   :  { %215 = dma.done.wait [#allocation4], 256  }
   0xa   :  { %216 = vsyncadd [#allocation4], 4294967040 }
   0xb   :  { %217 = dma.done.wait [#allocation7], 512  }
   0xc   :  { %218 = vsyncadd [#allocation7], 4294966784  ;;  %vm51_vm0 = vcmask 785408   ;;  %v225_v0 = vmov 0.0   ;;  %v61_v1 = vld [vmem:[#allocation6 + $0x18] sm:$0xff]  ;;  %v60_v2 = vld [vmem:[#allocation6 + $0x10] sm:$0xff] }
   0xd   :  { %52 = vst.msk [vmem:[#allocation2] sm:$0xff] %vm51_vm0, %v225_v0  ;;  %81 = vmatpush.msra.mxu0 %v61_v1  ;;  %132 = vmatpush.msra.mxu1 %v61_v1  ;;  %v59_v3 = vld [vmem:[#allocation6 + $0x8] sm:$0xff]  ;;  %v58_v4 = vld [vmem:[#allocation6] sm:$0xff]  ;;  %v56_v5 = vld [vmem:[#allocation3] sm:$0xff]  ;;  %vm62_vm1 = vcmask 261120   ;;  %s226_s24 = smov [#allocation8]  }
   0xe   :  { %53 = vst.msk [vmem:[#allocation2 + $0x8] sm:$0xff] %vm51_vm0, %v225_v0  ;;  %v57_v6 = vld [vmem:[#allocation3 + $0x8] sm:$0xff]  ;;  %v142_v13 = vld [vmem:[%s276_s2] ss:$0 sm:$0xff]  ;;  %s114_s25 = sshll.u32 %s226_s24, 4  ;;  %s116_s28 = sshll.u32 %s277_s3, 4  ;;  %s115_s25 = int_to_ptr.vmem [resolvable:$true] %s114_s25  ;;  %s117_s28 = int_to_ptr.hbm [resolvable:$true] %s116_s28 }
   0xf   :  { %82 = vmatpush.msra.mxu0 %v60_v2  ;;  %133 = vmatpush.msra.mxu1 %v60_v2 }
  0x11   :  { %83 = vmatpush.msra.mxu0 %v59_v3  ;;  %134 = vmatpush.msra.mxu1 %v59_v3 }
  0x13   :  { %84 = vmatpush.msra.mxu0 %v58_v4  ;;  %135 = vmatpush.msra.mxu1 %v58_v4 }
  0x14   :  { %130 = vmatmul.msk.f32.vlgmr.msra.gmra.mxu0 %vm62_vm1, %v56_v5  ;;  %131 = vmatmul.msk.f32.vlgmr.msra.gmra.mxu1 %vm62_vm1, %v57_v6  ;;  %v54_v7 = vld [vmem:[#allocation2] sm:$0xff] }
  0x15   :  { %v55_v8 = vld [vmem:[#allocation2 + $0x8] sm:$0xff] }
  0x91   :  { %v86_v9 = vpop.f32.mrf.mxu0  ;;  %v89_v10 = vpop.f32.mrf.mxu1 }
  0x92   :  { %v92_v11 = vadd.f32 %v86_v9, %v54_v7  ;;  %v93_v12 = vadd.f32 %v89_v10, %v55_v8 }
  0x94   :  { %95 = vst.msk [vmem:[#allocation2] sm:$0xff] %vm51_vm0, %v92_v11 }
  0x95   :  { %96 = vst.msk [vmem:[#allocation2 + $0x8] sm:$0xff] %vm51_vm0, %v93_v12 }
  0x9b   :  { %v100_v14 = vld [vmem:[#allocation2] sm:$0xff] }
  0x9c   :  { %v101_v15 = vld [vmem:[#allocation2 + $0x8] sm:$0xff]  ;;  %v106_v16 = vadd.f32 %v142_v13, %v100_v14 }
  0x9d   :  { %v107_v17 = vadd.f32 %v142_v13, %v101_v15 }
  0x9e   :  { %108 = vst.msk [vmem:[#allocation8] sm:$0xff] %vm51_vm0, %v106_v16 }
  0x9f   :  { %109 = vst.msk [vmem:[#allocation8 + $0x8] sm:$0xff] %vm51_vm0, %v107_v17 }
  0xa0   :  { %122 = dma.vmem_to_hbm [thread:$0]  %s115_s25, 256, %s117_s28, [#allocation5], %s222_s20, %s222_s20, %s223_s21  }
  0xa1   :  { %219 = dma.done.wait [#allocation5], 256  }
  0xa2   :  { %220 = vsyncadd [#allocation5], 4294967040 }
  0xa3   :  { %127 = vsyncpa [#allocation4], 1 }
  0xa4   :  { %128 = vsyncpa [#allocation7], 1 }
  0xa5   :  { %129 = vsyncpa [#allocation5], 1 }

</bundles_post_ra>
